<compile_context>
chip_gen: v7x
topology: tpu7x:2x2x1
jax: 0.10.0
libtpu: 0.0.40
codegen_flags: <defaults>
</compile_context>

<pallas_src>
import functools

import jax
import jax.numpy as jnp
from jax.experimental import pallas as pl
from jax.experimental.pallas import tpu as pltpu


_LANE = 128     # vreg lane width: feature dims padded to multiples of this
_SUBLANE = 8    # f32 sublane width: batch tile must be a multiple of this


def _round_up(n, m):
    return ((n + m - 1) // m) * m


def _make_fused_encoder_kernel(num_layers, compute_dtype):
    """Fused (Linear -> Tanh) x num_layers kernel.

    Ref order: x_ref, w_1, b_1, ..., w_L, b_L, o_ref.
    Intermediates never leave VMEM/vregs; only the final activation is stored.
    """
    def kernel(x_ref, *refs):
        o_ref = refs[-1]
        h = x_ref[...].astype(jnp.float32)
        for l in range(num_layers):             # static Python unroll (L is small)
            w = refs[2 * l][...]                 # (in_p, out_p) in compute_dtype
            b = refs[2 * l + 1][...]             # (1, out_p) f32, broadcast once
            y = jnp.dot(h.astype(compute_dtype), w,
                        preferred_element_type=jnp.float32)    # MXU, f32 acc
            h = jnp.tanh(y + b)                                 # f32 VPU + EUP
        o_ref[...] = h.astype(o_ref.dtype)       # lane-dense store (out_p % 128 == 0)
    return kernel


def prepare_encoder_params(params, compute_dtype=jnp.bfloat16):
    """Pad (lane multiples) and cast the parameters ONCE, outside the hot path.

    params: list of (w, b) with w: (in, out) f32, b: (1, out) f32.
    Returns a flat tuple (w1_p, b1_p, ..., wL_p, bL_p) ready for encoder_forward.
    """
    sizes = [params[0][0].shape[0]] + [w.shape[1] for w, _ in params]
    sizes_p = [_round_up(s, _LANE) for s in sizes]
    padded = []
    for l, (w, b) in enumerate(params):
        w_p = jnp.zeros((sizes_p[l], sizes_p[l + 1]), compute_dtype)
        w_p = w_p.at[: w.shape[0], : w.shape[1]].set(w.astype(compute_dtype))
        b_p = jnp.zeros((1, sizes_p[l + 1]), jnp.float32)
        b_p = b_p.at[:, : b.shape[1]].set(b.astype(jnp.float32))
        padded += [w_p, b_p]
    return tuple(padded)


@functools.partial(jax.jit, static_argnames=("out_features", "batch_tile"))
def encoder_forward(x, padded_params, out_features, batch_tile=512):
    """tanh(Linear_L(...tanh(Linear_1(x))...)) in a single fused Pallas call."""
    B, in_features = x.shape
    num_layers = len(padded_params) // 2
    weights = [padded_params[2 * l] for l in range(num_layers)]
    biases = [padded_params[2 * l + 1] for l in range(num_layers)]
    compute_dtype = weights[0].dtype
    sizes_p = [weights[0].shape[0]] + [w.shape[1] for w in weights]

    # ---- Batch tiling ------------------------------------------------------
    b8 = _round_up(B, _SUBLANE)
    tb = min(_round_up(batch_tile, _SUBLANE), b8)
    # Guarantee >= 2 batch tiles when the batch allows it, so 2-TC chips (v7x
    # megacore) get work on both cores under dimension_semantics=("parallel",).
    if b8 > _SUBLANE and b8 <= tb:
        tb = _round_up(pl.cdiv(b8, 2), _SUBLANE)
    b_pad = _round_up(b8, tb)
    grid = (b_pad // tb,)

    # ---- Pad only the activations (params were pre-padded once) -----------
    if (b_pad, sizes_p[0]) != (B, in_features):
        x_p = jnp.zeros((b_pad, sizes_p[0]), x.dtype).at[:B, :in_features].set(x)
    else:
        x_p = x

    # ---- Block specs: x/out tiled over batch; params whole resident blocks -
    in_specs = [pl.BlockSpec((tb, sizes_p[0]), lambda i: (i, 0))]
    flat_params = []
    for l in range(num_layers):
        in_specs.append(
            pl.BlockSpec((sizes_p[l], sizes_p[l + 1]), lambda i: (0, 0)))
        in_specs.append(
            pl.BlockSpec((1, sizes_p[l + 1]), lambda i: (0, 0)))
        flat_params += [weights[l], biases[l]]
    out_spec = pl.BlockSpec((tb, sizes_p[-1]), lambda i: (i, 0))

    # ---- VMEM budget: resident weights + double-buffered activation tiles --
    cd_bytes = jnp.dtype(compute_dtype).itemsize
    x_bytes = jnp.dtype(x.dtype).itemsize
    w_bytes = sum(sizes_p[l] * sizes_p[l + 1] for l in range(num_layers)) * cd_bytes
    bias_bytes = sum(_SUBLANE * sizes_p[l + 1] * 4 for l in range(num_layers))
    io_bytes = 2 * tb * (sizes_p[0] + sizes_p[-1]) * x_bytes
    vmem_limit = int(min(100 << 20,
                         2 * (w_bytes + bias_bytes + io_bytes) + (8 << 20)))

    # ---- Advisory cost estimate for XLA's scheduler ------------------------
    flops = 2 * b_pad * sum(sizes_p[l] * sizes_p[l + 1] for l in range(num_layers))
    transcendentals = b_pad * sum(sizes_p[1:])
    bytes_accessed = (b_pad * (sizes_p[0] + sizes_p[-1]) * x_bytes
                      + w_bytes + bias_bytes)

    out_p = pl.pallas_call(
        _make_fused_encoder_kernel(num_layers, compute_dtype),
        out_shape=jax.ShapeDtypeStruct((b_pad, sizes_p[-1]), x.dtype),
        grid=grid,
        in_specs=in_specs,
        out_specs=out_spec,
        compiler_params=pltpu.CompilerParams(
            dimension_semantics=("parallel",),   # shard batch tiles across TCs
            vmem_limit_bytes=vmem_limit,
        ),
        cost_estimate=pl.CostEstimate(
            flops=flops,
            transcendentals=transcendentals,
            bytes_accessed=bytes_accessed),
    )(x_p, *flat_params)

    # Slice padding off in the wrapper (kernel stores stay lane-dense).
    return out_p[:B, :out_features]


def init_encoder_params(key, input_size, code_size, hidden_sizes):
    """Deterministic synthetic parameters (same shapes as nn.Linear)."""
    layer_sizes = list(hidden_sizes) + [code_size]
    params = []
    prev = input_size
    for size in layer_sizes:
        key, kw, kb = jax.random.split(key, 3)
        bound = 1.0 / jnp.sqrt(prev)
        w = jax.random.uniform(kw, (prev, size), jnp.float32, -bound, bound)
        b = jax.random.uniform(kb, (1, size), jnp.float32, -bound, bound)
        params.append((w, b))
        prev = size
    return params


def encoder_forward_ref(x, params):
    """Pure-JAX f32 reference of the PyTorch module."""
    h = x
    for w, b in params:
        h = jnp.tanh(h @ w + b)
    return h


if __name__ == "__main__":
    key = jax.random.PRNGKey(0)
    batch = 8
    input_size = 32
    hidden_sizes = [64, 48]
    code_size = 16

    kx, kp = jax.random.split(key)
    x = jax.random.normal(kx, (batch, input_size), jnp.float32)
    params = init_encoder_params(kp, input_size, code_size, hidden_sizes)

    # Pad/cast parameters once (outside the per-step hot path).
    padded_params = prepare_encoder_params(params, compute_dtype=jnp.bfloat16)

    out = jax.block_until_ready(
        encoder_forward(x, padded_params, out_features=code_size))
    ref = encoder_forward_ref(x, params)

    assert out.shape == (batch, code_size), out.shape
    # bf16 matmul with f32 accumulation vs f32 reference: loose-but-safe tol.
    assert jnp.allclose(out, ref, atol=3e-2, rtol=3e-2), \
        float(jnp.max(jnp.abs(out - ref)))

    print("KERNEL_OK")
</pallas_src>

<mosaic_0001>
module attributes {stable_mosaic.version = 11 : i64} {
  func.func @kernel(%arg0: i32, %arg1: memref<8x128xf32, #tpu.memory_space<vmem>>, %arg2: memref<128x128xbf16, #tpu.memory_space<vmem>>, %arg3: memref<1x128xf32, #tpu.memory_space<vmem>>, %arg4: memref<128x128xbf16, #tpu.memory_space<vmem>>, %arg5: memref<1x128xf32, #tpu.memory_space<vmem>>, %arg6: memref<128x128xbf16, #tpu.memory_space<vmem>>, %arg7: memref<1x128xf32, #tpu.memory_space<vmem>>, %arg8: memref<8x128xf32, #tpu.memory_space<vmem>>) attributes {dimension_semantics = [#tpu.dimension_semantics<parallel>], iteration_bounds = array<i64: 1>, scalar_prefetch = 0 : i64, scratch_operands = 0 : i64, tpu.core_type = #tpu.core_type<tc>, window_params = [{transform_indices = @transform_0, window_bounds = array<i64: 8, 128>}, {pipeline_mode = #tpu.pipeline_mode<synchronous>, transform_indices = @transform_1, window_bounds = array<i64: 128, 128>}, {pipeline_mode = #tpu.pipeline_mode<synchronous>, transform_indices = @transform_2, window_bounds = array<i64: 1, 128>}, {pipeline_mode = #tpu.pipeline_mode<synchronous>, transform_indices = @transform_3, window_bounds = array<i64: 128, 128>}, {pipeline_mode = #tpu.pipeline_mode<synchronous>, transform_indices = @transform_4, window_bounds = array<i64: 1, 128>}, {pipeline_mode = #tpu.pipeline_mode<synchronous>, transform_indices = @transform_5, window_bounds = array<i64: 128, 128>}, {pipeline_mode = #tpu.pipeline_mode<synchronous>, transform_indices = @transform_6, window_bounds = array<i64: 1, 128>}, {transform_indices = @transform_7, window_bounds = array<i64: 8, 128>}]} {
    %c0 = arith.constant 0 : index
    %c0_0 = arith.constant 0 : index
    %0 = vector.load %arg1[%c0, %c0_0] : memref<8x128xf32, #tpu.memory_space<vmem>>, vector<8x128xf32>
    %c0_1 = arith.constant 0 : index
    %c0_2 = arith.constant 0 : index
    %1 = vector.load %arg2[%c0_1, %c0_2] : memref<128x128xbf16, #tpu.memory_space<vmem>>, vector<128x128xbf16>
    %c0_3 = arith.constant 0 : index
    %c0_4 = arith.constant 0 : index
    %2 = vector.load %arg3[%c0_3, %c0_4] : memref<1x128xf32, #tpu.memory_space<vmem>>, vector<1x128xf32>
    %3 = arith.truncf %0 : vector<8x128xf32> to vector<8x128xbf16>
    %cst = arith.constant dense<0.000000e+00> : vector<8x128xf32>
    %4 = tpu.matmul %3, %1, %cst {dimension_numbers = #tpu.dot_dimension_numbers<[1], [0], [0], [1], [0, 0, 1, 1], [], []>} : vector<8x128xbf16>, vector<128x128xbf16>, vector<8x128xf32> -> vector<8x128xf32>
    %5 = vector.broadcast %2 : vector<1x128xf32> to vector<8x128xf32>
    %6 = arith.addf %4, %5 : vector<8x128xf32>
    %7 = math.tanh %6 : vector<8x128xf32>
    %c0_5 = arith.constant 0 : index
    %c0_6 = arith.constant 0 : index
    %8 = vector.load %arg4[%c0_5, %c0_6] : memref<128x128xbf16, #tpu.memory_space<vmem>>, vector<128x128xbf16>
    %c0_7 = arith.constant 0 : index
    %c0_8 = arith.constant 0 : index
    %9 = vector.load %arg5[%c0_7, %c0_8] : memref<1x128xf32, #tpu.memory_space<vmem>>, vector<1x128xf32>
    %10 = arith.truncf %7 : vector<8x128xf32> to vector<8x128xbf16>
    %cst_9 = arith.constant dense<0.000000e+00> : vector<8x128xf32>
    %11 = tpu.matmul %10, %8, %cst_9 {dimension_numbers = #tpu.dot_dimension_numbers<[1], [0], [0], [1], [0, 0, 1, 1], [], []>} : vector<8x128xbf16>, vector<128x128xbf16>, vector<8x128xf32> -> vector<8x128xf32>
    %12 = vector.broadcast %9 : vector<1x128xf32> to vector<8x128xf32>
    %13 = arith.addf %11, %12 : vector<8x128xf32>
    %14 = math.tanh %13 : vector<8x128xf32>
    %c0_10 = arith.constant 0 : index
    %c0_11 = arith.constant 0 : index
    %15 = vector.load %arg6[%c0_10, %c0_11] : memref<128x128xbf16, #tpu.memory_space<vmem>>, vector<128x128xbf16>
    %c0_12 = arith.constant 0 : index
    %c0_13 = arith.constant 0 : index
    %16 = vector.load %arg7[%c0_12, %c0_13] : memref<1x128xf32, #tpu.memory_space<vmem>>, vector<1x128xf32>
    %17 = arith.truncf %14 : vector<8x128xf32> to vector<8x128xbf16>
    %cst_14 = arith.constant dense<0.000000e+00> : vector<8x128xf32>
    %18 = tpu.matmul %17, %15, %cst_14 {dimension_numbers = #tpu.dot_dimension_numbers<[1], [0], [0], [1], [0, 0, 1, 1], [], []>} : vector<8x128xbf16>, vector<128x128xbf16>, vector<8x128xf32> -> vector<8x128xf32>
    %19 = vector.broadcast %16 : vector<1x128xf32> to vector<8x128xf32>
    %20 = arith.addf %18, %19 : vector<8x128xf32>
    %21 = math.tanh %20 : vector<8x128xf32>
    %c0_15 = arith.constant 0 : index
    %c0_16 = arith.constant 0 : index
    %22 = vector.load %arg8[%c0_15, %c0_16] : memref<8x128xf32, #tpu.memory_space<vmem>>, vector<8x128xf32>
    tpu.vector_store %arg8[%c0_15, %c0_16], %21 {strides = array<i32>} : memref<8x128xf32, #tpu.memory_space<vmem>>, vector<8x128xf32>,
    return
  }
  func.func @transform_0(%arg0: i32) -> (i32, i32) {
    %c0_i32 = arith.constant 0 : i32
    %c0_i32_0 = arith.constant 0 : i32
    return %arg0, %c0_i32 : i32, i32
  }
  func.func @transform_1(%arg0: i32) -> (i32, i32) {
    %c0_i32 = arith.constant 0 : i32
    %c0_i32_0 = arith.constant 0 : i32
    %c0_i32_1 = arith.constant 0 : i32
    return %c0_i32, %c0_i32_0 : i32, i32
  }
  func.func @transform_2(%arg0: i32) -> (i32, i32) {
    %c0_i32 = arith.constant 0 : i32
    %c0_i32_0 = arith.constant 0 : i32
    %c0_i32_1 = arith.constant 0 : i32
    return %c0_i32, %c0_i32_0 : i32, i32
  }
  func.func @transform_3(%arg0: i32) -> (i32, i32) {
    %c0_i32 = arith.constant 0 : i32
    %c0_i32_0 = arith.constant 0 : i32
    %c0_i32_1 = arith.constant 0 : i32
    return %c0_i32, %c0_i32_0 : i32, i32
  }
  func.func @transform_4(%arg0: i32) -> (i32, i32) {
    %c0_i32 = arith.constant 0 : i32
    %c0_i32_0 = arith.constant 0 : i32
    %c0_i32_1 = arith.constant 0 : i32
    return %c0_i32, %c0_i32_0 : i32, i32
  }
  func.func @transform_5(%arg0: i32) -> (i32, i32) {
    %c0_i32 = arith.constant 0 : i32
    %c0_i32_0 = arith.constant 0 : i32
    %c0_i32_1 = arith.constant 0 : i32
    return %c0_i32, %c0_i32_0 : i32, i32
  }
  func.func @transform_6(%arg0: i32) -> (i32, i32) {
    %c0_i32 = arith.constant 0 : i32
    %c0_i32_0 = arith.constant 0 : i32
    %c0_i32_1 = arith.constant 0 : i32
    return %c0_i32, %c0_i32_0 : i32, i32
  }
  func.func @transform_7(%arg0: i32) -> (i32, i32) {
    %c0_i32 = arith.constant 0 : i32
    %c0_i32_0 = arith.constant 0 : i32
    return %arg0, %c0_i32 : i32, i32
  }
}

</mosaic_0001>

<bundles_post_ra>
// kernel: encoder_forward.1
= control target key start
LH: loop header
LB: loop body
LE: loop exit
PB: predicated region body
PF: predicated region fallthrough
CT: control target
= control target key end

     0   :  { %12 = vsyncpa [#allocation3], 0  ;;  %s826_s0 = inlined_call_operand.vmem [shape: f32[8,128], index: 0, kind: input, shape index: {}]   ;;  %s827_s1 = inlined_call_operand.hbm [shape: bf16[128,128], index: 1, kind: input, shape index: {}]   ;;  %s828_s2 = inlined_call_operand.vmem [shape: f32[1,128], index: 2, kind: input, shape index: {}]   ;;  %s829_s3 = inlined_call_operand.hbm [shape: bf16[128,128], index: 3, kind: input, shape index: {}]   ;;  %s830_s4 = inlined_call_operand.vmem [shape: f32[1,128], index: 4, kind: input, shape index: {}]   ;;  %s831_s5 = inlined_call_operand.hbm [shape: bf16[128,128], index: 5, kind: input, shape index: {}]   ;;  %s832_s6 = inlined_call_operand.vmem [shape: f32[1,128], index: 6, kind: input, shape index: {}]   ;;  %s833_s7 = inlined_call_operand.hbm [shape: f32[8,128], index: 7, kind: output, shape index: {}]  }
   0x1   :  { %13 = vsyncpa [#allocation6], 0 }
   0x2   :  { %14 = vsyncpa [#allocation4], 0  ;;  %s672_s24 = smov [#allocation5]   ;;  %s673_s26 = smov [#allocation2]  }
   0x3   :  { %s36_s25 = sshll.u32 %s672_s24, 4  ;;  %s22_s27 = sshll.u32 %s673_s26, 4  ;;  %s37_s25 = int_to_ptr.vmem [resolvable:$true] %s36_s25  ;;  %s720_s27 = int_to_ptr.vmem [resolvable:$true] %s22_s27 }
   0x4   :  { %s578_s30 = scalar_lea.hbm %s829_s3, 1024 }
   0x5   :  { %p579_p0 = scmp.ne.s32.totalorder %s829_s3, %s578_s30  ;;  %p582_p1 = scmp.lt.u32.totalorder %s578_s30, %s829_s3 }
   0x7   :  { %p584_p2 = pnand %p582_p1, %p579_p0 }
   0x9   :  { %587 = shalt.err (!%p584_p2)
}
   0xa   :  { %s588_s12 = scalar_lea.vmem %s37_s25, 1024  ;;  %p593_p4 = scmp.lt.s32.totalorder %s37_s25, %s37_s25 }
   0xb   :  { %p589_p3 = scmp.ne.s32.totalorder %s37_s25, %s588_s12  ;;  %p594_p5 = scmp.lt.s32.totalorder %s588_s12, %s588_s12 }
   0xd   :  { %p595_p6 = por %p594_p5, %p593_p4 }
   0xf   :  { %p596_p7 = pnand %p595_p6, %p589_p3 }
  0x11   :  { %599 = shalt.err (!%p596_p7)
}
  0x12   :  { %s674_s13 = smov 64   ;;  %s675_s14 = smov 4  }
  0x13   :  { %42 = dma.hbm_to_vmem [thread:$0]  %s829_s3, 1024, %s37_s25, [#allocation6], %s674_s13, %s674_s13, %s675_s14  }
  0x14   :  { %s600_s19 = scalar_lea.hbm %s827_s1, 1024 }
  0x15   :  { %p601_p8 = scmp.ne.s32.totalorder %s827_s1, %s600_s19  ;;  %p604_p9 = scmp.lt.u32.totalorder %s600_s19, %s827_s1 }
  0x17   :  { %p606_p10 = pnand %p604_p9, %p601_p8 }
  0x19   :  { %609 = shalt.err (!%p606_p10)
}
  0x1a   :  { %s610_s24 = scalar_lea.vmem %s720_s27, 1024  ;;  %p615_p12 = scmp.lt.s32.totalorder %s720_s27, %s720_s27 }
  0x1b   :  { %p611_p11 = scmp.ne.s32.totalorder %s720_s27, %s610_s24  ;;  %p616_p13 = scmp.lt.s32.totalorder %s610_s24, %s610_s24 }
  0x1d   :  { %p617_p0 = por %p616_p13, %p615_p12 }
  0x1f   :  { %p618_p1 = pnand %p617_p0, %p611_p11 }
  0x21   :  { %621 = shalt.err (!%p618_p1)
}
  0x22   :  { %28 = dma.hbm_to_vmem [thread:$0]  %s827_s1, 1024, %s720_s27, [#allocation3], %s674_s13, %s674_s13, %s675_s14  }
  0x23   :  { %s676_s26 = smov [#allocation7]   ;;  %s622_s8 = scalar_lea.hbm %s831_s5, 1024 }
  0x24   :  { %s50_s28 = sshll.u32 %s676_s26, 4  ;;  %p623_p2 = scmp.ne.s32.totalorder %s831_s5, %s622_s8  ;;  %s51_s28 = int_to_ptr.vmem [resolvable:$true] %s50_s28 }
  0x25   :  { %p626_p3 = scmp.lt.u32.totalorder %s622_s8, %s831_s5 }
  0x27   :  { %p628_p4 = pnand %p626_p3, %p623_p2 }
  0x29   :  { %631 = shalt.err (!%p628_p4)
}
  0x2a   :  { %s632_s15 = scalar_lea.vmem %s51_s28, 1024  ;;  %p637_p6 = scmp.lt.s32.totalorder %s51_s28, %s51_s28 }
  0x2b   :  { %p633_p5 = scmp.ne.s32.totalorder %s51_s28, %s632_s15  ;;  %p638_p7 = scmp.lt.s32.totalorder %s632_s15, %s632_s15 }
  0x2d   :  { %p639_p8 = por %p638_p7, %p637_p6 }
  0x2f   :  { %p640_p9 = pnand %p639_p8, %p633_p5 }
  0x31   :  { %643 = shalt.err (!%p640_p9)
}
  0x32   :  { %56 = dma.hbm_to_vmem [thread:$0]  %s831_s5, 1024, %s51_s28, [#allocation6], %s674_s13, %s674_s13, %s675_s14  }
  0x33   :  { %666 = dma.done.wait [#allocation3], 1024  }
  0x34   :  { %667 = vsyncadd [#allocation3], 4294966272 }
  0x35   :  { %668 = dma.done.wait [#allocation6], 2048  }
  0x36   :  { %669 = vsyncadd [#allocation6], 4294965248  ;;  %v677_v0 = vmov 0.0   ;;  %vm678_vm0 = vmmov 0   ;;  %v548_v1 = vld [vmem:[#allocation2] sm:$0xff]   ;;  %v549_v2 = vld [vmem:[#allocation2 + $0x8] sm:$0xff]  }
  0x37   :  { %480 = vmatprep.subr.bf16.mxu0 %v677_v0  ;;  %496 = vmatprep.mubr.msk.bf16.mxu0 %vm678_vm0, %v677_v0  ;;  %v550_v3 = vld [vmem:[#allocation2 + $0x10] sm:$0xff]   ;;  %v556_v4 = vld [vmem:[#allocation5] sm:$0xff]   ;;  %v551_v5 = vld [vmem:[#allocation2 + $0x18] sm:$0xff]  }
  0x38   :  { %500 = vmatprep.subr.bf16.mxu1 %v677_v0  ;;  %516 = vmatprep.mubr.msk.bf16.mxu1 %vm678_vm0, %v677_v0  ;;  %v557_v6 = vld [vmem:[#allocation5 + $0x8] sm:$0xff]   ;;  %v552_v7 = vld [vmem:[#allocation2 + $0x20] sm:$0xff]   ;;  %v558_v8 = vld [vmem:[#allocation5 + $0x10] sm:$0xff]  }
  0x39   :  { %481 = vmatpush3.bf16.msra.mxu0 %v548_v1  ;;  %501 = vmatpush3.bf16.msra.mxu1 %v556_v4  ;;  %v553_v9 = vld [vmem:[#allocation2 + $0x28] sm:$0xff]   ;;  %v559_v10 = vld [vmem:[#allocation5 + $0x18] sm:$0xff]   ;;  %v554_v11 = vld [vmem:[#allocation2 + $0x30] sm:$0xff]  }
  0x3a   :  { %482 = vmatprep.subr.bf16.mxu0 %v677_v0  ;;  %502 = vmatprep.subr.bf16.mxu1 %v677_v0  ;;  %v555_v12 = vld [vmem:[#allocation2 + $0x38] sm:$0xff]   ;;  %v69_v13 = vld [vmem:[%s826_s0] sm:$0xff]  ;;  %v561_v16 = vld [vmem:[#allocation5 + $0x28] sm:$0xff]  }
  0x3b   :  { %v87_v14 = vpack.c.bf16 %v69_v13, %v69_v13  ;;  %v560_v15 = vld [vmem:[#allocation5 + $0x20] sm:$0xff]   ;;  %v562_v17 = vld [vmem:[#allocation5 + $0x30] sm:$0xff]   ;;  %v563_v18 = vld [vmem:[#allocation5 + $0x38] sm:$0xff]  }
  0x3c   :  { %v564_v19 = vld [vmem:[#allocation7] sm:$0xff]   ;;  %v565_v20 = vld [vmem:[#allocation7 + $0x8] sm:$0xff]   ;;  %v566_v21 = vld [vmem:[#allocation7 + $0x10] sm:$0xff]  }
  0x3d   :  { %483 = vmatpush3.bf16.msra.mxu0 %v549_v2  ;;  %503 = vmatpush3.bf16.msra.mxu1 %v557_v6  ;;  %v567_v22 = vld [vmem:[#allocation7 + $0x18] sm:$0xff]   ;;  %v426_v23 = vld [vmem:[%s828_s2] ss:$0 sm:$0xff]  ;;  %v569_v32 = vld [vmem:[#allocation7 + $0x28] sm:$0xff]  }
  0x3e   :  { %484 = vmatprep.subr.bf16.mxu0 %v677_v0  ;;  %504 = vmatprep.subr.bf16.mxu1 %v677_v0  ;;  %v568_v31 = vld [vmem:[#allocation7 + $0x20] sm:$0xff]   ;;  %v570_v33 = vld [vmem:[#allocation7 + $0x30] sm:$0xff]   ;;  %v571_v34 = vld [vmem:[#allocation7 + $0x38] sm:$0xff]  }
  0x3f   :  { %v435_v35 = vld [vmem:[%s830_s4] ss:$0 sm:$0xff]  ;;  %s679_s4 = smov [#allocation8]  }
  0x40   :  { %v444_v43 = vld [vmem:[%s832_s6] ss:$0 sm:$0xff]  ;;  %s416_s19 = sshll.u32 %s679_s4, 4  ;;  %s417_s19 = int_to_ptr.vmem [resolvable:$true] %s416_s19 }
  0x41   :  { %485 = vmatpush3.bf16.msra.mxu0 %v550_v3  ;;  %505 = vmatpush3.bf16.msra.mxu1 %v558_v8  ;;  %s644_s20 = scalar_lea.vmem %s417_s19, 128  ;;  %p649_p11 = scmp.lt.s32.totalorder %s417_s19, %s417_s19 }
  0x42   :  { %486 = vmatprep.subr.bf16.mxu0 %v677_v0  ;;  %506 = vmatprep.subr.bf16.mxu1 %v677_v0  ;;  %p645_p10 = scmp.ne.s32.totalorder %s417_s19, %s644_s20  ;;  %p650_p12 = scmp.lt.s32.totalorder %s644_s20, %s644_s20 }
  0x44   :  { %p651_p13 = por %p650_p12, %p649_p11 }
  0x45   :  { %487 = vmatpush3.bf16.msra.mxu0 %v551_v5  ;;  %507 = vmatpush3.bf16.msra.mxu1 %v559_v10 }
  0x46   :  { %488 = vmatprep.subr.bf16.mxu0 %v677_v0  ;;  %508 = vmatprep.subr.bf16.mxu1 %v677_v0  ;;  %p652_p0 = pnand %p651_p13, %p645_p10 }
  0x49   :  { %489 = vmatpush3.bf16.msra.mxu0 %v552_v7  ;;  %509 = vmatpush3.bf16.msra.mxu1 %v560_v15 }
  0x4a   :  { %490 = vmatprep.subr.bf16.mxu0 %v677_v0  ;;  %510 = vmatprep.subr.bf16.mxu1 %v677_v0 }
  0x4d   :  { %491 = vmatpush3.bf16.msra.mxu0 %v553_v9  ;;  %511 = vmatpush3.bf16.msra.mxu1 %v561_v16 }
  0x4e   :  { %492 = vmatprep.subr.bf16.mxu0 %v677_v0  ;;  %512 = vmatprep.subr.bf16.mxu1 %v677_v0 }
  0x51   :  { %493 = vmatpush3.bf16.msra.mxu0 %v554_v11  ;;  %513 = vmatpush3.bf16.msra.mxu1 %v562_v17 }
  0x52   :  { %494 = vmatprep.subr.bf16.mxu0 %v677_v0  ;;  %514 = vmatprep.subr.bf16.mxu1 %v677_v0 }
  0x55   :  { %495 = vmatpush3.bf16.msra.mxu0 %v555_v12  ;;  %515 = vmatpush3.bf16.msra.mxu1 %v563_v18 }
  0x56   :  { %520 = vmatprep.subr.bf16.mxu0 %v677_v0 }
  0x58   :  { %497 = vmatmul.mubr.bf16.vlgmr.msra.gmra.mrb[0].mxu0 %v87_v14 }
  0x59   :  { %536 = vmatprep.mubr.msk.bf16.mxu0 %vm678_vm0, %v677_v0  ;;  %521 = vmatpush3.bf16.msra.mxu0 %v564_v19 }
  0x5a   :  { %522 = vmatprep.subr.bf16.mxu0 %v677_v0 }
  0x5d   :  { %523 = vmatpush3.bf16.msra.mxu0 %v565_v20 }
  0x5e   :  { %524 = vmatprep.subr.bf16.mxu0 %v677_v0 }
  0x61   :  { %525 = vmatpush3.bf16.msra.mxu0 %v566_v21 }
  0x62   :  { %526 = vmatprep.subr.bf16.mxu0 %v677_v0 }
  0x65   :  { %527 = vmatpush3.bf16.msra.mxu0 %v567_v22 }
  0x66   :  { %528 = vmatprep.subr.bf16.mxu0 %v677_v0 }
  0x69   :  { %529 = vmatpush3.bf16.msra.mxu0 %v568_v31 }
  0x6a   :  { %530 = vmatprep.subr.bf16.mxu0 %v677_v0 }
  0x6d   :  { %531 = vmatpush3.bf16.msra.mxu0 %v569_v32 }
  0x6e   :  { %532 = vmatprep.subr.bf16.mxu0 %v677_v0 }
  0x71   :  { %533 = vmatpush3.bf16.msra.mxu0 %v570_v33 }
  0x72   :  { %534 = vmatprep.subr.bf16.mxu0 %v677_v0 }
  0x75   :  { %535 = vmatpush3.bf16.msra.mxu0 %v571_v34 }
 0x12b   :  { %v176_v24 = vpop.f32.mrb[0].mxu0 }
 0x12c   :  { %v177_v25 = vadd.f32 %v426_v23, %v176_v24  ;;  %v498_v26 = vpop.f32.mrb[1].mxu0 }
 0x12d   :  { %v179_v27 = vpop.f32.mrb[2].mxu0 }
 0x12e   :  { %572 = vtanh.f32 %v177_v25  ;;  %v499_v28 = vpop.f32.mrb[3].mxu0 }
 0x138   :  { %v573_v29 = vpop.eup %572 }
 0x139   :  { %v200_v30 = vpack.c.bf16 %v573_v29, %v573_v29 }
 0x13b   :  { %517 = vmatmul.mubr.bf16.vlgmr.msra.gmra.mrb[0].mxu1 %v200_v30 }
 0x20e   :  { %v289_v36 = vpop.f32.mrb[0].mxu1 }
 0x20f   :  { %v290_v37 = vadd.f32 %v435_v35, %v289_v36  ;;  %v518_v38 = vpop.f32.mrb[1].mxu1 }
 0x210   :  { %v292_v39 = vpop.f32.mrb[2].mxu1 }
 0x211   :  { %574 = vtanh.f32 %v290_v37  ;;  %v519_v40 = vpop.f32.mrb[3].mxu1 }
 0x21b   :  { %v575_v41 = vpop.eup %574 }
 0x21c   :  { %v313_v42 = vpack.c.bf16 %v575_v41, %v575_v41 }
 0x21e   :  { %537 = vmatmul.mubr.bf16.vlgmr.msra.gmra.mrb[4].mxu0 %v313_v42 }
 0x2f1   :  { %v402_v44 = vpop.f32.mrb[4].mxu0 }
 0x2f2   :  { %v403_v45 = vadd.f32 %v444_v43, %v402_v44  ;;  %v538_v46 = vpop.f32.mrb[5].mxu0 }
 0x2f3   :  { %v405_v47 = vpop.f32.mrb[6].mxu0 }
 0x2f4   :  { %576 = vtanh.f32 %v403_v45  ;;  %v539_v48 = vpop.f32.mrb[7].mxu0 }
 0x2fe   :  { %v577_v49 = vpop.eup %576 }
 0x2ff   :  { %409 = vst [vmem:[#allocation8] sm:$0xff] %v577_v49 }
 0x300   :  { %655 = shalt.err (!%p652_p0)
}
 0x301   :  { %s656_s22 = scalar_lea.hbm %s833_s7, 128 }
 0x302   :  { %p657_p1 = scmp.ne.s32.totalorder %s833_s7, %s656_s22  ;;  %p660_p2 = scmp.lt.u32.totalorder %s656_s22, %s833_s7 }
 0x304   :  { %p662_p3 = pnand %p660_p2, %p657_p1 }
 0x306   :  { %665 = shalt.err (!%p662_p3)
}
 0x307   :  { %419 = dma.vmem_to_hbm [thread:$0]  %s417_s19, 128, %s833_s7, [#allocation4]  }
 0x308   :  { %670 = dma.done.wait [#allocation4], 128  }
 0x309   :  { %671 = vsyncadd [#allocation4], 4294967168 }
 0x30a   :  { %423 = vsyncpa [#allocation3], 1 }
 0x30b   :  { %424 = vsyncpa [#allocation6], 1 }
 0x30c   :  { %425 = vsyncpa [#allocation4], 1 }

</bundles_post_ra>
